<compile_context>
chip_gen: v7x
topology: tpu7x:2x2x1
jax: 0.10.0
libtpu: 0.0.40
codegen_flags: <defaults>
</compile_context>

<pallas_src>
import functools

import jax
import jax.numpy as jnp
from jax.experimental import pallas as pl
from jax.experimental.pallas import tpu as pltpu


def attention_kernel(x_ref, wqkv_ref, wo_ref, bias_ref, o_ref,
                     acc_ref, oheads_ref, *, heads_per_step, head_dim):
    G, D = heads_per_step, head_dim
    hg = pl.program_id(1)

    @pl.when(hg == 0)
    def _():
        acc_ref[...] = jnp.zeros_like(acc_ref)

    x = x_ref[0]                     # (N, C) in the compute dtype (bf16 or f32)
    cdt = x.dtype

    # Weights are fully VMEM-resident (constant index_map); pick this head group's slab
    # with a dynamic leading-axis index -- no per-step HBM weight re-fetch.
    w_qkv_g = wqkv_ref[hg]           # (C, 3*G*D)

    # One wide, lane-dense matmul produces q|k|v for all G heads of this group.
    # Softmax scale is already folded into the W_q columns.
    qkv = jnp.dot(x, w_qkv_g, preferred_element_type=jnp.float32)        # (N, 3*G*D) f32

    # Static unroll over the (small) head group.  For very large N / G, a lax.fori_loop
    # would bound live ranges better; G is kept modest so this stays spill-free.
    for g in range(G):
        off = g * 3 * D
        q = qkv[:, off + 0 * D: off + 1 * D].astype(cdt)                 # (N, D)
        k = qkv[:, off + 1 * D: off + 2 * D].astype(cdt)                 # (N, D)
        v = qkv[:, off + 2 * D: off + 3 * D].astype(cdt)                 # (N, D)

        # Scores: contract the last dims of q and k directly -- no transpose / XLU traffic.
        s = jax.lax.dot_general(q, k, (((1,), (1,)), ((), ())),
                                preferred_element_type=jnp.float32)      # (N, N) f32

        m = jnp.max(s, axis=-1, keepdims=True)
        p = jnp.exp(s - m)                                               # unnormalized probs
        denom = jnp.sum(p, axis=-1, keepdims=True)                       # (N, 1) f32

        pv = jnp.dot(p.astype(cdt), v, preferred_element_type=jnp.float32)   # (N, D) f32
        # Normalize the (N, D) result instead of the (N, N) matrix; exact reciprocal keeps
        # parity with the f32 PyTorch softmax.
        o_h = pv * pl.reciprocal(denom, approx=False)                    # (N, D) f32

        # Park this head's output at its static lane offset so the whole group's projection
        # is one deep-contraction matmul.
        oheads_ref[:, g * D:(g + 1) * D] = o_h.astype(cdt)

    # Single fused output projection for the head group, accumulated in f32.
    acc_ref[...] += jnp.dot(oheads_ref[...], wo_ref[hg],
                            preferred_element_type=jnp.float32)          # (N, C) f32

    @pl.when(hg == pl.num_programs(1) - 1)
    def _():
        out = acc_ref[...] + bias_ref[...]                               # (N, C) + (1, C), f32
        o_ref[0] = out.astype(o_ref.dtype)


def prepare_attention_params(wqkv, wproj, bproj, *, num_heads,
                             heads_per_step=None, compute_dtype=None):
    """One-time parameter preparation (head-major packing + scale folding).

    wqkv:  (C, 3C)  -- x @ wqkv layout (transposed vs. torch.nn.Linear weight)
    wproj: (C, C)
    bproj: (C,) or (1, C)
    """
    C = wqkv.shape[0]
    assert wqkv.shape == (C, 3 * C)
    assert wproj.shape == (C, C)
    H = num_heads
    assert C % H == 0
    D = C // H
    scale = D ** (-0.5)

    if heads_per_step is None:
        heads_per_step = next(g for g in (4, 2, 1) if H % g == 0)
    G = heads_per_step
    assert H % G == 0
    HG = H // G

    cdt = compute_dtype if compute_dtype is not None else wqkv.dtype

    # Fold the softmax scale into W_q (O(C*C) once, zero kernel cost).
    wq = wqkv[:, 0 * C:1 * C].reshape(C, H, D) * scale
    wk = wqkv[:, 1 * C:2 * C].reshape(C, H, D)
    wv = wqkv[:, 2 * C:3 * C].reshape(C, H, D)

    # Pack per head as [q | k | v] and group G heads along the lane dim:
    #   (HG, C, G*3*D), head g of a group occupies lanes [g*3D, (g+1)*3D).
    w = jnp.stack([wq, wk, wv], axis=2)                 # (C, H, 3, D)
    w = jnp.transpose(w, (1, 0, 2, 3))                  # (H, C, 3, D)
    w = w.reshape(HG, G, C, 3 * D)
    w = jnp.transpose(w, (0, 2, 1, 3))                  # (HG, C, G, 3D)
    wqkv_hm = w.reshape(HG, C, G * 3 * D)

    # Output projection rows for a head group are contiguous -> plain reshape.
    wo_hm = wproj.reshape(HG, G * D, C)

    return dict(
        wqkv_hm=jnp.asarray(wqkv_hm, dtype=cdt),
        wo_hm=jnp.asarray(wo_hm, dtype=cdt),
        bias=jnp.asarray(jnp.reshape(bproj, (1, C)), dtype=jnp.float32),
        heads_per_step=G,
        head_dim=D,
    )


@functools.partial(jax.jit, static_argnames=("heads_per_step", "head_dim"))
def attention_forward(x, wqkv_hm, wo_hm, bias, *, heads_per_step, head_dim):
    B, N, C = x.shape
    G, D = heads_per_step, head_dim
    HG = wqkv_hm.shape[0]
    cdt = wqkv_hm.dtype
    xc = x.astype(cdt) if x.dtype != cdt else x

    kernel = functools.partial(attention_kernel,
                               heads_per_step=G, head_dim=D)

    return pl.pallas_call(
        kernel,
        out_shape=jax.ShapeDtypeStruct((B, N, C), x.dtype),
        grid_spec=pltpu.PrefetchScalarGridSpec(
            num_scalar_prefetch=0,
            grid=(B, HG),
            in_specs=[
                # x: one batch row; block index is constant across the head-group axis,
                # so it is fetched once per batch.
                pl.BlockSpec((1, N, C), lambda b, g: (b, 0, 0)),
                # Weights: constant index_map -> DMA'd from HBM once, VMEM-resident for the
                # whole kernel (head group selected inside the kernel).
                pl.BlockSpec((HG, C, 3 * G * D), lambda b, g: (0, 0, 0)),
                pl.BlockSpec((HG, G * D, C), lambda b, g: (0, 0, 0)),
                pl.BlockSpec((1, C), lambda b, g: (0, 0)),       # proj bias (f32)
            ],
            out_specs=pl.BlockSpec((1, N, C), lambda b, g: (b, 0, 0)),
            scratch_shapes=[
                pltpu.VMEM((N, C), jnp.float32),   # f32 output-projection accumulator
                pltpu.VMEM((N, G * D), cdt),       # per-group concatenated head outputs
            ],
        ),
        compiler_params=pltpu.CompilerParams(
            dimension_semantics=("parallel", "arbitrary"),
            # Raise the scoped VMEM limit explicitly (defaults are 16/32 MiB); stays under
            # v7x's 64 MiB physical VMEM with headroom.
            vmem_limit_bytes=56 * 1024 * 1024,
        ),
    )(xc, wqkv_hm, wo_hm, bias)


def attention_reference(x, wqkv, wproj, bproj, *, num_heads):
    # Pure-JAX reference mirroring the PyTorch forward exactly.
    B, N, C = x.shape
    D = C // num_heads
    scale = D ** (-0.5)
    qkv = (x @ wqkv).reshape(B, N, 3, num_heads, D)
    qkv = jnp.transpose(qkv, (2, 0, 3, 1, 4))              # (3, B, H, N, D)
    q, k, v = qkv[0], qkv[1], qkv[2]
    attn = jnp.einsum("bhnd,bhmd->bhnm", q, k) * scale
    attn = jax.nn.softmax(attn, axis=-1)
    out = jnp.einsum("bhnm,bhmd->bhnd", attn, v)
    out = jnp.transpose(out, (0, 2, 1, 3)).reshape(B, N, C)
    return out @ wproj + jnp.reshape(bproj, (1, C))


if __name__ == "__main__":
    # Small shapes consistent with the module: dim divisible by num_heads=8.
    B, N, C = 2, 8, 32
    NUM_HEADS = 8

    key = jax.random.PRNGKey(0)
    kx, kqkv, kproj, kb = jax.random.split(key, 4)

    x = jax.random.normal(kx, (B, N, C), dtype=jnp.float32)
    wqkv = jax.random.normal(kqkv, (C, 3 * C), dtype=jnp.float32) * 0.05   # qkv_bias=False
    wproj = jax.random.normal(kproj, (C, C), dtype=jnp.float32) * 0.05
    bproj = jax.random.normal(kb, (C,), dtype=jnp.float32) * 0.05          # torch-style (C,) bias

    ref = attention_reference(x, wqkv, wproj, bproj, num_heads=NUM_HEADS)

    # f32 compute path (exact parity with the PyTorch f32 math).
    params = prepare_attention_params(wqkv, wproj, bproj, num_heads=NUM_HEADS)
    out = attention_forward(x, params["wqkv_hm"], params["wo_hm"], params["bias"],
                            heads_per_step=params["heads_per_step"],
                            head_dim=params["head_dim"])
    out = jax.block_until_ready(out)
    assert out.shape == (B, N, C)
    assert jnp.allclose(out, ref, atol=1e-4, rtol=1e-4), "f32 path mismatch vs reference"

    # bf16 compute path (MXU-native rates); accuracy intentionally looser.
    params_bf16 = prepare_attention_params(wqkv, wproj, bproj, num_heads=NUM_HEADS,
                                           compute_dtype=jnp.bfloat16)
    out_bf16 = attention_forward(x, params_bf16["wqkv_hm"], params_bf16["wo_hm"],
                                 params_bf16["bias"],
                                 heads_per_step=params_bf16["heads_per_step"],
                                 head_dim=params_bf16["head_dim"])
    out_bf16 = jax.block_until_ready(out_bf16)
    assert jnp.allclose(out_bf16, ref, atol=5e-2, rtol=5e-2), "bf16 path too far from reference"

    print("KERNEL_OK")
</pallas_src>

<mosaic_0001>
module attributes {stable_mosaic.version = 11 : i64} {
  func.func @attention_kernel(%arg0: i32, %arg1: i32, %arg2: memref<1x8x32xf32, #tpu.memory_space<vmem>>, %arg3: memref<2x32x48xf32, #tpu.memory_space<vmem>>, %arg4: memref<2x16x32xf32, #tpu.memory_space<vmem>>, %arg5: memref<1x32xf32, #tpu.memory_space<vmem>>, %arg6: memref<1x8x32xf32, #tpu.memory_space<vmem>>, %arg7: memref<8x32xf32, #tpu.memory_space<vmem>>, %arg8: memref<8x16xf32, #tpu.memory_space<vmem>>) attributes {dimension_semantics = [#tpu.dimension_semantics<parallel>, #tpu.dimension_semantics<arbitrary>], iteration_bounds = array<i64: 2, 2>, scalar_prefetch = 0 : i64, scratch_operands = 2 : i64, tpu.core_type = #tpu.core_type<tc>, window_params = [{transform_indices = @transform_0, window_bounds = array<i64: 1, 8, 32>}, {pipeline_mode = #tpu.pipeline_mode<synchronous>, transform_indices = @transform_1, window_bounds = array<i64: 2, 32, 48>}, {pipeline_mode = #tpu.pipeline_mode<synchronous>, transform_indices = @transform_2, window_bounds = array<i64: 2, 16, 32>}, {pipeline_mode = #tpu.pipeline_mode<synchronous>, transform_indices = @transform_3, window_bounds = array<i64: 1, 32>}, {transform_indices = @transform_4, window_bounds = array<i64: 1, 8, 32>}]} {
    %c0_i32 = arith.constant 0 : i32
    %0 = arith.cmpi eq, %arg1, %c0_i32 : i32
    %1 = arith.extui %0 : i1 to i32
    %c0_i32_0 = arith.constant 0 : i32
    %2 = arith.cmpi ne, %1, %c0_i32_0 : i32
    scf.if %2 {
      %cst_36 = arith.constant 0.000000e+00 : f32
      %84 = vector.broadcast %cst_36 : f32 to vector<8x32xf32>
      %c0_37 = arith.constant 0 : index
      %c0_38 = arith.constant 0 : index
      %85 = vector.load %arg7[%c0_37, %c0_38] : memref<8x32xf32, #tpu.memory_space<vmem>>, vector<8x32xf32>
      tpu.vector_store %arg7[%c0_37, %c0_38], %84 {strides = array<i32>} : memref<8x32xf32, #tpu.memory_space<vmem>>, vector<8x32xf32>,
    } else {
    }
    %c0 = arith.constant 0 : index
    %c0_1 = arith.constant 0 : index
    %c0_2 = arith.constant 0 : index
    %3 = vector.load %arg2[%c0, %c0_1, %c0_2] : memref<1x8x32xf32, #tpu.memory_space<vmem>>, vector<1x8x32xf32>
    %4 = vector.shape_cast %3 : vector<1x8x32xf32> to vector<8x32xf32>
    %5 = arith.index_cast %arg1 : i32 to index
    %c0_3 = arith.constant 0 : index
    %c0_4 = arith.constant 0 : index
    %6 = vector.load %arg3[%5, %c0_3, %c0_4] : memref<2x32x48xf32, #tpu.memory_space<vmem>>, vector<1x32x48xf32>
    %7 = vector.shape_cast %6 : vector<1x32x48xf32> to vector<32x48xf32>
    %cst = arith.constant dense<0.000000e+00> : vector<8x48xf32>
    %8 = tpu.matmul %4, %7, %cst {dimension_numbers = #tpu.dot_dimension_numbers<[1], [0], [0], [1], [0, 0, 1, 1], [], []>} : vector<8x32xf32>, vector<32x48xf32>, vector<8x48xf32> -> vector<8x48xf32>
    %9 = vector.extract_strided_slice %8 {offsets = [0, 0], sizes = [8, 4], strides = [1, 1]} : vector<8x48xf32> to vector<8x4xf32>
    %10 = vector.extract_strided_slice %8 {offsets = [0, 4], sizes = [8, 4], strides = [1, 1]} : vector<8x48xf32> to vector<8x4xf32>
    %11 = vector.extract_strided_slice %8 {offsets = [0, 8], sizes = [8, 4], strides = [1, 1]} : vector<8x48xf32> to vector<8x4xf32>
    %cst_5 = arith.constant dense<0.000000e+00> : vector<8x8xf32>
    %12 = tpu.matmul %9, %10, %cst_5 {dimension_numbers = #tpu.dot_dimension_numbers<[1], [1], [0], [0], [0, 0, 1, 0], [], []>} : vector<8x4xf32>, vector<8x4xf32>, vector<8x8xf32> -> vector<8x8xf32>
    %cst_6 = arith.constant dense<0xFF800000> : vector<8xf32>
    %13 = vector.multi_reduction <maximumf>, %12, %cst_6 [1] : vector<8x8xf32> to vector<8xf32>
    %14 = vector.shape_cast %13 : vector<8xf32> to vector<8x1xf32>
    %15 = vector.broadcast %14 : vector<8x1xf32> to vector<8x8xf32>
    %16 = arith.subf %12, %15 : vector<8x8xf32>
    %17 = math.exp %16 : vector<8x8xf32>
    %cst_7 = arith.constant dense<0.000000e+00> : vector<8xf32>
    %18 = vector.multi_reduction <add>, %17, %cst_7 [1] : vector<8x8xf32> to vector<8xf32>
    %19 = vector.shape_cast %18 : vector<8xf32> to vector<8x1xf32>
    %cst_8 = arith.constant dense<0.000000e+00> : vector<8x4xf32>
    %20 = tpu.matmul %17, %11, %cst_8 {dimension_numbers = #tpu.dot_dimension_numbers<[1], [0], [0], [1], [0, 0, 1, 1], [], []>} : vector<8x8xf32>, vector<8x4xf32>, vector<8x4xf32> -> vector<8x4xf32>
    %21 = tpu.reciprocal %19 : vector<8x1xf32> -> vector<8x1xf32>
    %22 = vector.broadcast %21 : vector<8x1xf32> to vector<8x4xf32>
    %23 = arith.mulf %20, %22 : vector<8x4xf32>
    %c0_9 = arith.constant 0 : index
    %c0_10 = arith.constant 0 : index
    %24 = vector.load %arg8[%c0_9, %c0_10] : memref<8x16xf32, #tpu.memory_space<vmem>>, vector<8x4xf32>
    tpu.vector_store %arg8[%c0_9, %c0_10], %23 {strides = array<i32>} : memref<8x16xf32, #tpu.memory_space<vmem>>, vector<8x4xf32>,
    %25 = vector.extract_strided_slice %8 {offsets = [0, 12], sizes = [8, 4], strides = [1, 1]} : vector<8x48xf32> to vector<8x4xf32>
    %26 = vector.extract_strided_slice %8 {offsets = [0, 16], sizes = [8, 4], strides = [1, 1]} : vector<8x48xf32> to vector<8x4xf32>
    %27 = vector.extract_strided_slice %8 {offsets = [0, 20], sizes = [8, 4], strides = [1, 1]} : vector<8x48xf32> to vector<8x4xf32>
    %cst_11 = arith.constant dense<0.000000e+00> : vector<8x8xf32>
    %28 = tpu.matmul %25, %26, %cst_11 {dimension_numbers = #tpu.dot_dimension_numbers<[1], [1], [0], [0], [0, 0, 1, 0], [], []>} : vector<8x4xf32>, vector<8x4xf32>, vector<8x8xf32> -> vector<8x8xf32>
    %cst_12 = arith.constant dense<0xFF800000> : vector<8xf32>
    %29 = vector.multi_reduction <maximumf>, %28, %cst_12 [1] : vector<8x8xf32> to vector<8xf32>
    %30 = vector.shape_cast %29 : vector<8xf32> to vector<8x1xf32>
    %31 = vector.broadcast %30 : vector<8x1xf32> to vector<8x8xf32>
    %32 = arith.subf %28, %31 : vector<8x8xf32>
    %33 = math.exp %32 : vector<8x8xf32>
    %cst_13 = arith.constant dense<0.000000e+00> : vector<8xf32>
    %34 = vector.multi_reduction <add>, %33, %cst_13 [1] : vector<8x8xf32> to vector<8xf32>
    %35 = vector.shape_cast %34 : vector<8xf32> to vector<8x1xf32>
    %cst_14 = arith.constant dense<0.000000e+00> : vector<8x4xf32>
    %36 = tpu.matmul %33, %27, %cst_14 {dimension_numbers = #tpu.dot_dimension_numbers<[1], [0], [0], [1], [0, 0, 1, 1], [], []>} : vector<8x8xf32>, vector<8x4xf32>, vector<8x4xf32> -> vector<8x4xf32>
    %37 = tpu.reciprocal %35 : vector<8x1xf32> -> vector<8x1xf32>
    %38 = vector.broadcast %37 : vector<8x1xf32> to vector<8x4xf32>
    %39 = arith.mulf %36, %38 : vector<8x4xf32>
    %c0_15 = arith.constant 0 : index
    %c4 = arith.constant 4 : index
    %40 = vector.load %arg8[%c0_15, %c4] : memref<8x16xf32, #tpu.memory_space<vmem>>, vector<8x4xf32>
    tpu.vector_store %arg8[%c0_15, %c4], %39 {strides = array<i32>} : memref<8x16xf32, #tpu.memory_space<vmem>>, vector<8x4xf32>,
    %41 = vector.extract_strided_slice %8 {offsets = [0, 24], sizes = [8, 4], strides = [1, 1]} : vector<8x48xf32> to vector<8x4xf32>
    %42 = vector.extract_strided_slice %8 {offsets = [0, 28], sizes = [8, 4], strides = [1, 1]} : vector<8x48xf32> to vector<8x4xf32>
    %43 = vector.extract_strided_slice %8 {offsets = [0, 32], sizes = [8, 4], strides = [1, 1]} : vector<8x48xf32> to vector<8x4xf32>
    %cst_16 = arith.constant dense<0.000000e+00> : vector<8x8xf32>
    %44 = tpu.matmul %41, %42, %cst_16 {dimension_numbers = #tpu.dot_dimension_numbers<[1], [1], [0], [0], [0, 0, 1, 0], [], []>} : vector<8x4xf32>, vector<8x4xf32>, vector<8x8xf32> -> vector<8x8xf32>
    %cst_17 = arith.constant dense<0xFF800000> : vector<8xf32>
    %45 = vector.multi_reduction <maximumf>, %44, %cst_17 [1] : vector<8x8xf32> to vector<8xf32>
    %46 = vector.shape_cast %45 : vector<8xf32> to vector<8x1xf32>
    %47 = vector.broadcast %46 : vector<8x1xf32> to vector<8x8xf32>
    %48 = arith.subf %44, %47 : vector<8x8xf32>
    %49 = math.exp %48 : vector<8x8xf32>
    %cst_18 = arith.constant dense<0.000000e+00> : vector<8xf32>
    %50 = vector.multi_reduction <add>, %49, %cst_18 [1] : vector<8x8xf32> to vector<8xf32>
    %51 = vector.shape_cast %50 : vector<8xf32> to vector<8x1xf32>
    %cst_19 = arith.constant dense<0.000000e+00> : vector<8x4xf32>
    %52 = tpu.matmul %49, %43, %cst_19 {dimension_numbers = #tpu.dot_dimension_numbers<[1], [0], [0], [1], [0, 0, 1, 1], [], []>} : vector<8x8xf32>, vector<8x4xf32>, vector<8x4xf32> -> vector<8x4xf32>
    %53 = tpu.reciprocal %51 : vector<8x1xf32> -> vector<8x1xf32>
    %54 = vector.broadcast %53 : vector<8x1xf32> to vector<8x4xf32>
    %55 = arith.mulf %52, %54 : vector<8x4xf32>
    %c0_20 = arith.constant 0 : index
    %c8 = arith.constant 8 : index
    %56 = vector.load %arg8[%c0_20, %c8] : memref<8x16xf32, #tpu.memory_space<vmem>>, vector<8x4xf32>
    tpu.vector_store %arg8[%c0_20, %c8], %55 {strides = array<i32>} : memref<8x16xf32, #tpu.memory_space<vmem>>, vector<8x4xf32>,
    %57 = vector.extract_strided_slice %8 {offsets = [0, 36], sizes = [8, 4], strides = [1, 1]} : vector<8x48xf32> to vector<8x4xf32>
    %58 = vector.extract_strided_slice %8 {offsets = [0, 40], sizes = [8, 4], strides = [1, 1]} : vector<8x48xf32> to vector<8x4xf32>
    %59 = vector.extract_strided_slice %8 {offsets = [0, 44], sizes = [8, 4], strides = [1, 1]} : vector<8x48xf32> to vector<8x4xf32>
    %cst_21 = arith.constant dense<0.000000e+00> : vector<8x8xf32>
    %60 = tpu.matmul %57, %58, %cst_21 {dimension_numbers = #tpu.dot_dimension_numbers<[1], [1], [0], [0], [0, 0, 1, 0], [], []>} : vector<8x4xf32>, vector<8x4xf32>, vector<8x8xf32> -> vector<8x8xf32>
    %cst_22 = arith.constant dense<0xFF800000> : vector<8xf32>
    %61 = vector.multi_reduction <maximumf>, %60, %cst_22 [1] : vector<8x8xf32> to vector<8xf32>
    %62 = vector.shape_cast %61 : vector<8xf32> to vector<8x1xf32>
    %63 = vector.broadcast %62 : vector<8x1xf32> to vector<8x8xf32>
    %64 = arith.subf %60, %63 : vector<8x8xf32>
    %65 = math.exp %64 : vector<8x8xf32>
    %cst_23 = arith.constant dense<0.000000e+00> : vector<8xf32>
    %66 = vector.multi_reduction <add>, %65, %cst_23 [1] : vector<8x8xf32> to vector<8xf32>
    %67 = vector.shape_cast %66 : vector<8xf32> to vector<8x1xf32>
    %cst_24 = arith.constant dense<0.000000e+00> : vector<8x4xf32>
    %68 = tpu.matmul %65, %59, %cst_24 {dimension_numbers = #tpu.dot_dimension_numbers<[1], [0], [0], [1], [0, 0, 1, 1], [], []>} : vector<8x8xf32>, vector<8x4xf32>, vector<8x4xf32> -> vector<8x4xf32>
    %69 = tpu.reciprocal %67 : vector<8x1xf32> -> vector<8x1xf32>
    %70 = vector.broadcast %69 : vector<8x1xf32> to vector<8x4xf32>
    %71 = arith.mulf %68, %70 : vector<8x4xf32>
    %c0_25 = arith.constant 0 : index
    %c12 = arith.constant 12 : index
    %72 = vector.load %arg8[%c0_25, %c12] : memref<8x16xf32, #tpu.memory_space<vmem>>, vector<8x4xf32>
    tpu.vector_store %arg8[%c0_25, %c12], %71 {strides = array<i32>} : memref<8x16xf32, #tpu.memory_space<vmem>>, vector<8x4xf32>,
    %c0_26 = arith.constant 0 : index
    %c0_27 = arith.constant 0 : index
    %73 = vector.load %arg7[%c0_26, %c0_27] : memref<8x32xf32, #tpu.memory_space<vmem>>, vector<8x32xf32>
    %c0_28 = arith.constant 0 : index
    %c0_29 = arith.constant 0 : index
    %74 = vector.load %arg8[%c0_28, %c0_29] : memref<8x16xf32, #tpu.memory_space<vmem>>, vector<8x16xf32>
    %75 = arith.index_cast %arg1 : i32 to index
    %c0_30 = arith.constant 0 : index
    %c0_31 = arith.constant 0 : index
    %76 = vector.load %arg4[%75, %c0_30, %c0_31] : memref<2x16x32xf32, #tpu.memory_space<vmem>>, vector<1x16x32xf32>
    %77 = vector.shape_cast %76 : vector<1x16x32xf32> to vector<16x32xf32>
    %cst_32 = arith.constant dense<0.000000e+00> : vector<8x32xf32>
    %78 = tpu.matmul %74, %77, %cst_32 {dimension_numbers = #tpu.dot_dimension_numbers<[1], [0], [0], [1], [0, 0, 1, 1], [], []>} : vector<8x16xf32>, vector<16x32xf32>, vector<8x32xf32> -> vector<8x32xf32>
    %79 = arith.addf %73, %78 : vector<8x32xf32>
    %c0_33 = arith.constant 0 : index
    %c0_34 = arith.constant 0 : index
    %80 = vector.load %arg7[%c0_33, %c0_34] : memref<8x32xf32, #tpu.memory_space<vmem>>, vector<8x32xf32>
    tpu.vector_store %arg7[%c0_33, %c0_34], %79 {strides = array<i32>} : memref<8x32xf32, #tpu.memory_space<vmem>>, vector<8x32xf32>,
    %c1_i32 = arith.constant 1 : i32
    %81 = arith.cmpi eq, %arg1, %c1_i32 : i32
    %82 = arith.extui %81 : i1 to i32
    %c0_i32_35 = arith.constant 0 : i32
    %83 = arith.cmpi ne, %82, %c0_i32_35 : i32
    scf.if %83 {
      %c0_36 = arith.constant 0 : index
      %c0_37 = arith.constant 0 : index
      %84 = vector.load %arg7[%c0_36, %c0_37] : memref<8x32xf32, #tpu.memory_space<vmem>>, vector<8x32xf32>
      %c0_38 = arith.constant 0 : index
      %c0_39 = arith.constant 0 : index
      %85 = vector.load %arg5[%c0_38, %c0_39] : memref<1x32xf32, #tpu.memory_space<vmem>>, vector<1x32xf32>
      %86 = vector.broadcast %85 : vector<1x32xf32> to vector<8x32xf32>
      %87 = arith.addf %84, %86 : vector<8x32xf32>
      %c0_40 = arith.constant 0 : index
      %c0_41 = arith.constant 0 : index
      %c0_42 = arith.constant 0 : index
      %88 = vector.load %arg6[%c0_40, %c0_41, %c0_42] : memref<1x8x32xf32, #tpu.memory_space<vmem>>, vector<1x8x32xf32>
      %89 = vector.shape_cast %88 : vector<1x8x32xf32> to vector<8x32xf32>
      %90 = vector.shape_cast %87 : vector<8x32xf32> to vector<1x8x32xf32>
      tpu.vector_store %arg6[%c0_40, %c0_41, %c0_42], %90 {strides = array<i32>} : memref<1x8x32xf32, #tpu.memory_space<vmem>>, vector<1x8x32xf32>,
    } else {
    }
    return
  }
  func.func @transform_0(%arg0: i32, %arg1: i32) -> (i32, i32, i32) {
    %c0_i32 = arith.constant 0 : i32
    %c0_i32_0 = arith.constant 0 : i32
    %c0_i32_1 = arith.constant 0 : i32
    return %arg0, %c0_i32, %c0_i32_0 : i32, i32, i32
  }
  func.func @transform_1(%arg0: i32, %arg1: i32) -> (i32, i32, i32) {
    %c0_i32 = arith.constant 0 : i32
    %c0_i32_0 = arith.constant 0 : i32
    %c0_i32_1 = arith.constant 0 : i32
    %c0_i32_2 = arith.constant 0 : i32
    return %c0_i32, %c0_i32_0, %c0_i32_1 : i32, i32, i32
  }
  func.func @transform_2(%arg0: i32, %arg1: i32) -> (i32, i32, i32) {
    %c0_i32 = arith.constant 0 : i32
    %c0_i32_0 = arith.constant 0 : i32
    %c0_i32_1 = arith.constant 0 : i32
    %c0_i32_2 = arith.constant 0 : i32
    return %c0_i32, %c0_i32_0, %c0_i32_1 : i32, i32, i32
  }
  func.func @transform_3(%arg0: i32, %arg1: i32) -> (i32, i32) {
    %c0_i32 = arith.constant 0 : i32
    %c0_i32_0 = arith.constant 0 : i32
    %c0_i32_1 = arith.constant 0 : i32
    return %c0_i32, %c0_i32_0 : i32, i32
  }
  func.func @transform_4(%arg0: i32, %arg1: i32) -> (i32, i32, i32) {
    %c0_i32 = arith.constant 0 : i32
    %c0_i32_0 = arith.constant 0 : i32
    %c0_i32_1 = arith.constant 0 : i32
    return %arg0, %c0_i32, %c0_i32_0 : i32, i32, i32
  }
}

</mosaic_0001>

<bundles_post_ra>
// kernel: attention_forward.1
= control target key start
LH: loop header
LB: loop body
LE: loop exit
PB: predicated region body
PF: predicated region fallthrough
CT: control target
= control target key end

     0   :  { %s2072_s0 = inlined_call_operand.hbm [shape: f32[2,8,32], index: 0, kind: input, shape index: {}]   ;;  %s2073_s1 = inlined_call_operand.hbm [shape: f32[2,32,48], index: 1, kind: input, shape index: {}]   ;;  %s2074_s2 = inlined_call_operand.hbm [shape: f32[2,16,32], index: 2, kind: input, shape index: {}]   ;;  %s2075_s3 = inlined_call_operand.vmem [shape: f32[1,32], index: 3, kind: input, shape index: {}]   ;;  %s2076_s4 = inlined_call_operand.hbm [shape: f32[2,8,32], index: 4, kind: output, shape index: {}]  }
   0x1   :  { %2082 = sst [smem:[#allocation15_spill]] %s2073_s1 }
   0x2   :  { %9 = vsyncpa [#allocation5], 0 }
   0x3   :  { %11 = vsyncpa [#allocation5 + $0x1], 0 }
   0x4   :  { %12 = vsyncpa [#allocation8], 0 }
   0x5   :  { %13 = vsyncpa [#allocation6], 0 }
   0x6   :  { %15 = vsyncpa [#allocation6 + $0x1], 0  ;;  %s1736_s15 = smov 0   ;;  %s1738_s16 = smov 0  }
   0x7   :  { %s1740_s17 = smov 0   ;;  %s1742_s18 = smov 0  }
   0x8   :  { %s1744_s19 = smov 0   ;;  %s1746_s20 = smov 0  }
   0x9   :  { %s1748_s21 = smov 0   ;;  %s1750_s22 = smov 0  }
   0xa LB: > { %s1235_s23 = sadd.s32 4294967295, %s1685_s22   ;;  %s1236_s24 = sadd.s32 4294967294, %s1685_s22   ;;  %s1685_s22 = sphi %s1750_s22, %s21_s22   ;;  %s1681_s21 = sphi %s1748_s21, %s2106_s21   ;;  %s1677_s20 = sphi %s1746_s20, %s2105_s20   ;;  %s1673_s19 = sphi %s1744_s19, %s2104_s19   ;;  %s1669_s18 = sphi %s1742_s18, %s2103_s18   ;;  %s1665_s17 = sphi %s1740_s17, %s2102_s17   ;;  %s1661_s16 = sphi %s1738_s16, %s2101_s16   ;;  %s1657_s15 = sphi %s1736_s15, %s2100_s15  }
   0xb   : > { %p53_p0 = scmp.ne.s32.totalorder %s1661_s16, %s1657_s15  ;;  %p1780_p1 = scmp.eq.s32.totalorder %s1235_s23, 0 }
   0xc   : > { %p1784_p2 = scmp.eq.s32.totalorder %s1235_s23, 3  ;;  %p146_p3 = scmp.eq.s32.totalorder %s1236_s24, 3 }
   0xd   : > { %s2083_s25 = scalar_select %p1780_p1, 1, 0 }
   0xe   : > { %s2084_s26 = scalar_select %p1784_p2, 1, 0 }
   0xf   : > { %p1790_p4 = por %p1780_p1, %p53_p0  ;;  %p1237_p5 = scmp.ge.s32.totalorder %s1685_s22, 1 }
  0x10   : > { %p1795_p6 = por %p146_p3, %p53_p0  ;;  %p153_p7 = scmp.lt.s32.totalorder %s1685_s22, 5 }
  0x11   : > { %s2085_s27 = scalar_select %p1790_p4, 1, 0 }
  0x12   : > { %s2086_s28 = scalar_select %p1795_p6, 1, 0 }
  0x13   : > { %p1800_p8 = pnand %p1237_p5, %p153_p7  ;;  %s1687_s30 = smov [#allocation7]  }
  0x14   : > { %2087 = sst [smem:[#allocation14_spill]] %s2086_s28  ;;  %s165_s5 = sshll.u32 %s1687_s30, 4  ;;  %s166_s5 = int_to_ptr.vmem [resolvable:$true] %s165_s5 }
  0x15   : > { %s2088_s29 = scalar_select %p1800_p8, 1, 0 }
  0x16   : > { %p1374_p9 = pneg %p1800_p8  ;;  %s1688_s7 = smov [#allocation9]  }
  0x17   : > { %s178_s8 = sshll.u32 %s1688_s7, 4  ;;  %s2090_s1 = sld [smem:[#allocation15_spill]]  ;;  %s1812_s8 = int_to_ptr.vmem [resolvable:$true] %s178_s8 }
  0x18   : > { %p1808_p10 = pnand %p1374_p9, %p1780_p1 }
  0x1a   : > { %p1499_p12 = pneg %p1808_p10 }
  0x1d   : > { %s1497_s11 = scalar_lea.hbm %s2090_s1, 1024 }
  0x1e   : > { %p1498_p11 = scmp.ne.s32.totalorder %s2090_s1, %s1497_s11  ;;  %p1504_p3 = scmp.lt.u32.totalorder %s1497_s11, %s2090_s1 }
  0x20   : > { %p1500_p13 = pnand %p1499_p12, %p1498_p11 }
  0x22   : > { %p1501_p0 = pneg %p1500_p13 }
  0x24   : > { %p1506_p5 = pnand %p1504_p3, %p1501_p0 }
  0x26   : > { %1509 = shalt.err (!%p1506_p5)
}
  0x27   : > { %s1510_s24 = scalar_lea.vmem %s166_s5, 1024  ;;  %p1518_p1 = scmp.lt.s32.totalorder %s166_s5, %s166_s5 }
  0x28   : > { %p1511_p7 = scmp.ne.s32.totalorder %s166_s5, %s1510_s24  ;;  %p1519_p4 = scmp.lt.s32.totalorder %s1510_s24, %s1510_s24 }
  0x2a   : > { %p1513_p9 = pnand %p1511_p7, %p1499_p12  ;;  %p1520_p8 = por %p1519_p4, %p1518_p1 }
  0x2c   : > { %p1514_p6 = pneg %p1513_p9 }
  0x2e   : > { %p1521_p2 = pnand %p1520_p8, %p1514_p6 }
  0x30   : > { %1524 = shalt.err (!%p1521_p2)
}
  0x31   : > { %s1689_s30 = smov 128   ;;  %s1690_s7 = smov 8  }
  0x32   : > { %1377 = dma.hbm_to_vmem [thread:$0]  (!%p1808_p10), %s2090_s1, 1024, %s166_s5, [#allocation8], %s1689_s30, %s1689_s30, %s1690_s7  }
  0x33   : > { %s1525_s13 = scalar_lea.hbm %s2074_s2, 512 }
  0x34   : > { %p1526_p11 = scmp.ne.s32.totalorder %s2074_s2, %s1525_s13  ;;  %p1532_p4 = scmp.lt.u32.totalorder %s1525_s13, %s2074_s2 }
  0x36   : > { %p1528_p1 = pnand %p1526_p11, %p1499_p12 }
  0x38   : > { %p1529_p2 = pneg %p1528_p1 }
  0x3a   : > { %p1534_p6 = pnand %p1532_p4, %p1529_p2 }
  0x3c   : > { %1537 = shalt.err (!%p1534_p6)
}
  0x3d   : > { %s1538_s5 = scalar_lea.vmem %s1812_s8, 512  ;;  %p1546_p3 = scmp.lt.s32.totalorder %s1812_s8, %s1812_s8 }
  0x3e   : > { %p1539_p8 = scmp.ne.s32.totalorder %s1812_s8, %s1538_s5  ;;  %p1547_p5 = scmp.lt.s32.totalorder %s1538_s5, %s1538_s5 }
  0x40   : > { %p1541_p13 = pnand %p1539_p8, %p1499_p12  ;;  %p1548_p7 = por %p1547_p5, %p1546_p3 }
  0x42   : > { %p1542_p0 = pneg %p1541_p13 }
  0x44   : > { %p1549_p9 = pnand %p1548_p7, %p1542_p0 }
  0x46   : > { %1552 = shalt.err (!%p1549_p9)
}
  0x47   : > { %1380 = dma.hbm_to_vmem [thread:$0]  (!%p1808_p10), %s2074_s2, 512, %s1812_s8, [#allocation8], %s1689_s30, %s1689_s30, %s1690_s7  }
  0x48   : > { %s30_s10 = sadd.s32 1, %s1677_s20  ;;  %s33_s11 = sadd.s32 1, %s1681_s21 }
  0x49   : > { %p31_p12 = scmp.ge.s32.totalorder %s30_s10, 2  ;;  %s40_s6 = sadd.s32 1, %s1665_s17 }
  0x4a   : > { %p47_p11 = scmp.ne.s32.totalorder %s1665_s17, %s1661_s16  ;;  %p48_p1 = scmp.eq.s32.totalorder %s1685_s22, 0 }
  0x4b   : > { %s2108_s10 = smov (%p31_p12, %s30_s10), 0  ;;  %s2110_s11 = smov (!%p31_p12, %s33_s11), %s1681_s21 }
  0x4c   : > { %p1870_p2 = por %p48_p1, %p47_p11  ;;  %p2092_p4 = scmp.ne.s32.totalorder %s2084_s26, 0 }
  0x4d   : > { %p35_p10 = scmp.ge.s32.totalorder %s2110_s11, 2  ;;  %p1391_p8 = scmp.lt.s32.totalorder %s1685_s22, 4 }
  0x4e   : > { %p1876_p6 = por %p2092_p4, %p47_p11  ;;  %s195_s8 = sand.u32 1, %s1665_s17  }
  0x4f   : > { %s1242_s30 = sshll.u32 %s1681_s21, 7  ;;  %s2112_s11 = smov (%p35_p10, %s2110_s11), 0 }
  0x50   : > { %s1241_s7 = sshll.u32 %s195_s8, 3  ;;  %s37_s14 = ssub.s32 %s1681_s21, %s2112_s11 }
  0x51   : > { %p38_p13 = scmp.eq.s32.totalorder %s37_s14, 0  ;;  %s1890_s5 = scalar_lea.hbm %s2072_s0, %s1242_s30 }
  0x52   : > { %s199_s26 = scalar_lea.vmem [#allocation4], %s1241_s7  ;;  %p1894_p0 = pnand %p1391_p8, %p1870_p2 }
  0x53   : > { %s206_s28 = sshll.u32 %s199_s26, 4  ;;  %s196_s14 = scalar_lea.sflag [#allocation5], %s195_s8  ;;  %s1901_s28 = int_to_ptr.vmem [resolvable:$true] %s206_s28 }
  0x54   : > { %s1899_s1 = scalar_select %p38_p13, %s1665_s17, %s40_s6  }
  0x55   : > { %s1553_s30 = scalar_lea.hbm %s1890_s5, 128  ;;  %p1555_p5 = pneg %p1894_p0 }
  0x56   : > { %p1554_p3 = scmp.ne.s32.totalorder %s1890_s5, %s1553_s30  ;;  %s1558_s23 = scalar_lea.hbm %s2072_s0, 256 }
  0x57   : > { %p1559_p12 = scmp.lt.u32.totalorder %s1890_s5, %s2072_s0  ;;  %p1560_p11 = scmp.lt.u32.totalorder %s1558_s23, %s1553_s30 }
  0x58   : > { %p1556_p7 = pnand %p1555_p5, %p1554_p3  ;;  %p1562_p2 = scmp.lt.u32.totalorder %s1553_s30, %s1890_s5 }
  0x59   : > { %p1561_p1 = por %p1560_p11, %p1559_p12 }
  0x5a   : > { %p1557_p9 = pneg %p1556_p7 }
  0x5b   : > { %p1563_p4 = por %p1562_p2, %p1561_p1 }
  0x5d   : > { %p1564_p10 = pnand %p1563_p4, %p1557_p9 }
  0x5f   : > { %1567 = shalt.err (!%p1564_p10)
}
  0x60   : > { %s1568_s6 = scalar_lea.vmem %s1901_s28, 128  ;;  %s1691_s8 = smov [#allocation4]  }
  0x61   : > { %p1569_p8 = scmp.ne.s32.totalorder %s1901_s28, %s1568_s6  ;;  %s1573_s12 = sshll.u32 %s1691_s8, 4  ;;  %s1574_s12 = int_to_ptr.vmem [resolvable:$false] %s1573_s12 }
  0x62   : > { %s1575_s7 = scalar_lea.vmem %s1574_s12, 256  ;;  %p1576_p7 = scmp.lt.s32.totalorder %s1901_s28, %s1574_s12 }
  0x63   : > { %p1571_p13 = pnand %p1569_p8, %p1555_p5  ;;  %p1577_p12 = scmp.lt.s32.totalorder %s1575_s7, %s1568_s6 }
  0x65   : > { %p1572_p3 = pneg %p1571_p13  ;;  %p1578_p11 = por %p1577_p12, %p1576_p7 }
  0x67   : > { %p1579_p1 = pnand %p1578_p11, %p1572_p3 }
  0x69   : > { %1582 = shalt.err (!%p1579_p1)
}
  0x6a   : > { %1384 = dma.hbm_to_vmem [thread:$0]  (!%p1894_p0), %s1890_s5, 128, %s1901_s28, %s196_s14  }
  0x6b   : > { %p2095_p9 = scmp.ne.s32.totalorder %s2088_s29, 0 }
  0x6c   : > { %s1931_s30 = sand.u32 (!%p2095_p9), 1, %s1661_s16   ;;  %p2096_p5 = scmp.ne.s32.totalorder (!%p2095_p9), %s2085_s27, 0 }
  0x6d   : > { %215 = sbr.rel (%p2095_p9) target bundleno = 1480 (0x5c8), region = 36  ;;  %s1244_s23 = sshll.u32 (!%p2095_p9), %s1931_s30, 3 }
  0x6e   : > { %s218_s24 = scalar_lea.sflag (!%p2095_p9), [#allocation5], %s1931_s30  ;;  %s221_s26 = scalar_lea.vmem (!%p2095_p9), [#allocation4], %s1244_s23 }
  0x74   : > { %1644 = dma.done.wait (%p2096_p5), %s218_s24, 128  }
  0x75   : > { %1646 = vsyncadd (%p2096_p5), %s218_s24, 4294967168  ;;  %p2097_p2 = scmp.ne.s32.totalorder %s2083_s25, 0 }
  0x77   : > { %1648 = dma.done.wait (%p2097_p2), [#allocation8], 1536  }
  0x78   : > { %1650 = vsyncadd (%p2097_p2), [#allocation8], 4294965760  ;;  %s1943_s29 = scalar_lea.vmem [#allocation10], %s1244_s23  ;;  %p1248_p0 = scmp.ne.s32.totalorder %s1669_s18, 0 }
  0x79   : > { %vm258_vm0 = vcmask (!%p1248_p0), 261120   ;;  %v1692_v0 = vmov (!%p1248_p0), 0.0  }
  0x7a   : > { %257 = sbr.rel (%p1248_p0) target bundleno = 129 (0x81), region = 52  ;;  %259 = vst.msk [vmem:[#allocation2] sm:$0xff] (!%p1248_p0), %vm258_vm0, %v1692_v0 }
  0x81 PF: > { %s1249_s5 = sshll.u32 %s1669_s18, 5  ;;  %v1693_v1 = vmov 0.0|0.0   ;;  %vm1694_vm1 = vmmov 0   ;;  %v1695_v2 = vmov 0.0   ;;  %v260_v9 = vld [vmem:[%s221_s26] sm:$0xff]  ;;  %vm267_vm2 = vcmask 261120  }
  0x82   : > { %1353 = vmatprep.subr.bf16.mxu0 %v1693_v1  ;;  %1303 = vmatprep.mubr.msk.f32.mxu0 %vm1694_vm1, %v1695_v2  ;;  %s262_s25 = scalar_lea.vmem [#allocation7], %s1249_s5  ;;  %s1696_s27 = smov 116   ;;  %vm344_vm3 = vcmask 31744   ;;  %vm419_vm4 = vcmask 64512   ;;  %vm677_vm5 = vcmask 64544   ;;  %vm848_vm6 = vcmask 97344  }
  0x83   : > { %v263_v3 = vld [vmem:[%s262_s25] sm:$0xff]  ;;  %v264_v4 = vld [vmem:[%s262_s25 + $0x8] sm:$0xff]  ;;  %v265_v5 = vld [vmem:[%s262_s25 + $0x10] sm:$0xff]  ;;  %1306 = vmatprep.subr.mxu1 %v1695_v2  ;;  %1308 = vmatprep.mubr.msk.f32.mxu1 %vm1694_vm1, %v1695_v2  ;;  %s1697_s28 = smov 124   ;;  %s1698_s9 = smov 100   ;;  %vm1019_vm7 = vcmask 130144  }
  0x84   : > { %v1354_v6 = vpack.c.bf16 %v264_v4, %v263_v3  ;;  %v266_v7 = vld [vmem:[%s262_s25 + $0x18] sm:$0xff]  ;;  %s1699_s14 = smov 112   ;;  %s1700_s6 = smov 88   ;;  %vm1027_vm8 = vcmask 130048  }
  0x85   : > { %v1357_v8 = vpack.c.bf16 %v266_v7, %v265_v5  ;;  %s1701_s8 = smov 104   ;;  %s1702_s12 = smov 92  }
  0x86   : > { %1355 = vmatpush3.bf16.msra.mxu0 %v1354_v6  ;;  %s1703_s7 = smov 108   ;;  %s1704_s23 = smov 120  }
  0x87   : > { %1356 = vmatprep.subr.bf16.mxu0 %v1693_v1  ;;  %s1705_s24 = smov 84   ;;  %s1706_s26 = smov 96  }
  0x88   : > { %s1707_s5 = smov 4   ;;  %s1263_s25 = sshll.u32 %s1669_s18, 4 }
  0x89   : > { %p1265_p4 = scmp.ne.s32.totalorder %s1669_s18, 1 }
  0x8a   : > { %1358 = vmatpush3.bf16.msra.mxu0 %v1357_v8 }
  0x8b   : > { %1316 = vmatprep.subr.mxu0 %v1695_v2 }
  0x8d   : > { %1304 = vmatmul.mubr.msk.f32.vlgmr.msra.gmra.mrb[0].mxu0 %vm267_vm2, %v260_v9 }
  0x8e   : > { %1318 = vmatprep.mubr.msk.f32.mxu0 %vm1694_vm1, %v1695_v2 }
 0x160   : > { %v1956_v10 = vpop.f32.mrb[0].mxu0 }
 0x161   : > { %508 = vrot.lane.b32.xlu1 %v1956_v10, %s1696_s27  ;;  %342 = vrot.lane.b32.xlu0 %v1956_v10, %s1697_s28  ;;  %v1305_v11 = vpop.f32.mrb[1].mxu0  ;;  %s1024_s27 = scalar_lea.vmem [#allocation9], %s1263_s25  ;;  %s1708_s28 = smov 8  }
 0x162   : > { %v1025_v7 = vld [vmem:[%s1024_s27] sm:$0xff]  ;;  %v1026_v8 = vld [vmem:[%s1024_s27 + $0x8] sm:$0xff] }
 0x163   : > { %v1360_v9 = vpack.c.bf16 %v1026_v8, %v1025_v7 }
 0x165   : > { %681 = vrot.lane.b32.xlu1 %v1956_v10, %s1698_s9  ;;  %510 = vrot.lane.b32.xlu0 %v1956_v10, %s1699_s14  ;;  %s1709_s9 = smov 12  }
 0x169   : > { %852 = vrot.lane.b32.xlu1 %v1956_v10, %s1700_s6  ;;  %679 = vrot.lane.b32.xlu0 %v1956_v10, %s1701_s8 }
 0x16d   : > { %850 = vrot.lane.b32.xlu0 %v1956_v10, %s1702_s12 }
 0x1d3   : > { %v509_v12 = vpop.permute.xlu1 %508  ;;  %v343_v13 = vpop.permute.xlu0 %342 }
 0x1d4   : > { %1307 = vmatpush3.xpose.msk.msra.mxu1 %vm344_vm3, %v343_v13 }
 0x1d5   : > { %1311 = vmatprep.subr.mxu1 %v1695_v2 }
 0x1d7   : > { %1309 = vmatmul.mubr.msk.f32.vlgmr.msra.gmra.mrb[0].mxu1 %vm344_vm3, %v1956_v10  ;;  %v511_v14 = vpop.permute.xlu0 %510  ;;  %v682_v15 = vpop.permute.xlu1 %681 }
 0x1d8   : > { %1317 = vmatpush3.xpose.msk.msra.mxu0 %vm344_vm3, %v511_v14  ;;  %1313 = vmatprep.mubr.msk.f32.mxu1 %vm1694_vm1, %v1695_v2 }
 0x1d9   : > { %1326 = vmatprep.subr.mxu0 %v1695_v2 }
 0x1db   : > { %1319 = vmatmul.mubr.msk.f32.vlgmr.msra.gmra.mrb[2].mxu0 %vm344_vm3, %v509_v12  ;;  %v680_v16 = vpop.permute.xlu0 %679  ;;  %v853_v17 = vpop.permute.xlu1 %852 }
 0x1dc   : > { %1327 = vmatpush3.xpose.msk.msra.mxu0 %vm344_vm3, %v682_v15  ;;  %1328 = vmatprep.mubr.msk.f32.mxu0 %vm1694_vm1, %v1695_v2 }
 0x1dd   : > { %1336 = vmatprep.subr.mxu0 %v1695_v2 }
 0x1df   : > { %1329 = vmatmul.mubr.msk.f32.vlgmr.msra.gmra.mrb[4].mxu0 %vm344_vm3, %v680_v16  ;;  %v851_v18 = vpop.permute.xlu0 %850 }
 0x1e0   : > { %1337 = vmatpush3.xpose.msk.msra.mxu0 %vm344_vm3, %v853_v17  ;;  %1338 = vmatprep.mubr.msk.f32.mxu0 %vm1694_vm1, %v1695_v2 }
 0x1e1   : > { %1359 = vmatprep.subr.bf16.mxu0 %v1693_v1 }
 0x1e3   : > { %1339 = vmatmul.mubr.msk.f32.vlgmr.msra.gmra.mrb[6].mxu0 %vm344_vm3, %v851_v18  ;;  %v1021_v18 = vld [vmem:[#allocation2] sm:$0xff] }
 0x1e4   : > { %1350 = vmatprep.mubr.msk.f32.mxu0 %vm1694_vm1, %v1695_v2  ;;  %1361 = vmatpush3.bf16.msra.mxu0 %v1360_v9 }
 0x2aa   : > { %v415_v19 = vpop.f32.mrb[0].mxu1 }
 0x2ab   : > { %v1310_v20 = vpop.f32.mrb[1].mxu1  ;;  %v420_v21 = vsel %vm419_vm4, %v415_v19, -inf }
 0x2ac   : > { %421 = vmax.xlane.f32.xlu1 %v420_v21 }
 0x2ae   : > { %v582_v22 = vpop.f32.mrb[2].mxu0 }
 0x2af   : > { %v1320_v23 = vpop.f32.mrb[3].mxu0  ;;  %v586_v24 = vsel %vm419_vm4, %v582_v22, -inf }
 0x2b0   : > { %587 = vmax.xlane.f32.xlu0 %v586_v24  ;;  %v1266_v23 = vld [vmem:[%s2075_s3] ss:$0 sm:$0xff] (!%p1265_p4) }
 0x2b2   : > { %v753_v25 = vpop.f32.mrb[4].mxu0 }
 0x2b3   : > { %v1330_v26 = vpop.f32.mrb[5].mxu0  ;;  %v757_v27 = vsel %vm419_vm4, %v753_v25, -inf }
 0x2b4   : > { %758 = vmax.xlane.f32.xlu0 %v757_v27 }
 0x2b6   : > { %v924_v28 = vpop.f32.mrb[6].mxu0 }
 0x2b7   : > { %v1340_v29 = vpop.f32.mrb[7].mxu0  ;;  %v928_v30 = vsel %vm419_vm4, %v924_v28, -inf }
 0x2bd   : > { %595 = vrot.lane.b32.xlu1 %v1956_v10, %s1703_s7 }
 0x2ca   : > { %429 = vrot.lane.b32.xlu0 %v1956_v10, %s1704_s23 }
 0x2ce   : > { %937 = vrot.lane.b32.xlu0 %v1956_v10, %s1705_s24 }
 0x2e1   : > { %929 = vmax.xlane.f32.xlu1 %v928_v30 }
 0x2f2   : > { %766 = vrot.lane.b32.xlu1 %v1956_v10, %s1706_s26 }
 0x339   : > { %v422_v31 = vpop.xlane.xlu1 %421 }
 0x33a   : > { %v423_v32 = vsub.f32 %v415_v19, %v422_v31 }
 0x33c   : > { %v424_v33 = vmul.f32 1.442695, %v423_v32 }
 0x33d   : > { %v588_v34 = vpop.xlane.xlu0 %587  ;;  %v596_v42 = vpop.permute.xlu1 %595 }
 0x33e   : > { %1481 = vpow2.f32 %v424_v33  ;;  %v589_v35 = vsub.f32 %v582_v22, %v588_v34 }
 0x340   : > { %v590_v36 = vmul.f32 1.442695, %v589_v35 }
 0x341   : > { %v759_v37 = vpop.xlane.xlu0 %758 }
 0x342   : > { %1483 = vpow2.f32 %v590_v36  ;;  %v760_v38 = vsub.f32 %v753_v25, %v759_v37 }
 0x344   : > { %v761_v39 = vmul.f32 1.442695, %v760_v38 }
 0x345   : > { %v430_v40 = vpop.permute.xlu0 %429 }
 0x346   : > { %1485 = vpow2.f32 %v761_v39  ;;  %1312 = vmatpush3.msra.mxu1 %v430_v40 }
 0x347   : > { %1321 = vmatprep.subr.mxu1 %v1695_v2 }
 0x348   : > { %v1482_v41 = vpop.eup %1481 }
 0x349   : > { %1314 = vmatmul.mubr.msk.f32.vlgmr.msra.gmra.mrb[2].mxu1 %vm419_vm4, %v1482_v41  ;;  %v426_v47 = vsel %vm419_vm4, %v1482_v41, 0.0  ;;  %v938_v52 = vpop.permute.xlu0 %937 }
 0x34a   : > { %1322 = vmatpush3.msra.mxu1 %v596_v42  ;;  %1323 = vmatprep.mubr.msk.f32.mxu1 %vm1694_vm1, %v1695_v2 }
 0x34b   : > { %1331 = vmatprep.subr.mxu1 %v1695_v2 }
 0x34c   : > { %v1484_v43 = vpop.eup %1483 }
 0x34d   : > { %1324 = vmatmul.mubr.msk.f32.vlgmr.msra.gmra.mrb[4].mxu1 %vm419_vm4, %v1484_v43  ;;  %v592_v44 = vsel %vm419_vm4, %v1484_v43, 0.0 }
 0x34e   : > { %593 = vadd.xlane.f32.xlu1 %v592_v44  ;;  %1333 = vmatprep.mubr.msk.f32.mxu1 %vm1694_vm1, %v1695_v2 }
 0x350   : > { %v1486_v45 = vpop.eup %1485 }
 0x351   : > { %v763_v46 = vsel %vm419_vm4, %v1486_v45, 0.0 }
 0x352   : > { %764 = vadd.xlane.f32.xlu0 %v763_v46  ;;  %427 = vadd.xlane.f32.xlu1 %v426_v47 }
 0x36e   : > { %v930_v48 = vpop.xlane.xlu1 %929 }
 0x36f   : > { %v931_v49 = vsub.f32 %v924_v28, %v930_v48 }
 0x371   : > { %v932_v50 = vmul.f32 1.442695, %v931_v49 }
 0x372   : > { %v767_v51 = vpop.permute.xlu1 %766 }
 0x373   : > { %1487 = vpow2.f32 %v932_v50  ;;  %1332 = vmatpush3.msra.mxu1 %v767_v51 }
 0x374   : > { %1334 = vmatmul.mubr.msk.f32.vlgmr.msra.gmra.mrb[6].mxu1 %vm419_vm4, %v1486_v45  ;;  %1341 = vmatprep.subr.mxu1 %v1695_v2 }
 0x375   : > { %1342 = vmatpush3.msra.mxu1 %v938_v52  ;;  %1343 = vmatprep.mubr.msk.f32.mxu1 %vm1694_vm1, %v1695_v2 }
 0x37d   : > { %v1488_v53 = vpop.eup %1487 }
 0x37e   : > { %1344 = vmatmul.mubr.msk.f32.vlgmr.msra.gmra.mrb[8].mxu1 %vm419_vm4, %v1488_v53  ;;  %v934_v54 = vsel %vm419_vm4, %v1488_v53, 0.0 }
 0x37f   : > { %935 = vadd.xlane.f32.xlu0 %v934_v54 }
 0x3db   : > { %v594_v55 = vpop.xlane.xlu1 %593 }
 0x3df   : > { %v428_v56 = vpop.xlane.xlu1 %427  ;;  %v765_v1 = vpop.xlane.xlu0 %764 }
 0x3e0   : > { %1489 = vrcp.f32 %v428_v56 }
 0x3e1   : > { %1491 = vrcp.f32 %v594_v55 }
 0x3e2   : > { %1493 = vrcp.f32 %v765_v1 }
 0x3ea   : > { %v1490_v57 = vpop.eup %1489 }
 0x3eb   : > { %v1492_v61 = vpop.eup %1491 }
 0x3ec   : > { %v1494_v3 = vpop.eup %1493 }
 0x40c   : > { %v936_v2 = vpop.xlane.xlu0 %935 }
 0x40d   : > { %1495 = vrcp.f32 %v936_v2 }
 0x417   : > { %v1496_v10 = vpop.eup %1495 }
 0x41c   : > { %v501_v58 = vpop.f32.mrb[2].mxu1 }
 0x41d   : > { %v506_v59 = vmul.f32 %v1490_v57, %v501_v58  ;;  %v1315_v60 = vpop.f32.mrb[3].mxu1 }
 0x41f   : > { %507 = vst.msk [vmem:[#allocation3] sm:$0xff] %vm344_vm3, %v506_v59 }
 0x420   : > { %v667_v62 = vpop.f32.mrb[4].mxu1 }
 0x421   : > { %v672_v63 = vmul.f32 %v1492_v61, %v667_v62  ;;  %v1325_v0 = vpop.f32.mrb[5].mxu1 }
 0x423   : > { %674 = vrot.lane.b32.xlu0 %v672_v63, %s1707_s5 }
 0x447   : > { %v838_v4 = vpop.f32.mrb[6].mxu1 }
 0x448   : > { %v843_v5 = vmul.f32 %v1494_v3, %v838_v4  ;;  %v1335_v6 = vpop.f32.mrb[7].mxu1 }
 0x44a   : > { %845 = vrot.lane.b32.xlu1 %v843_v5, %s1708_s28 }
 0x451   : > { %v1009_v11 = vpop.f32.mrb[8].mxu1 }
 0x452   : > { %v1014_v12 = vmul.f32 %v1496_v10, %v1009_v11  ;;  %v1345_v13 = vpop.f32.mrb[9].mxu1 }
 0x454   : > { %1016 = vrot.lane.b32.xlu1 %v1014_v12, %s1709_s9 }
 0x495   : > { %v675_v14 = vpop.permute.xlu0 %674 }
 0x496   : > { %678 = vst.msk [vmem:[#allocation3] sm:$0xff] %vm677_vm5, %v675_v14 }
 0x4bc   : > { %v846_v15 = vpop.permute.xlu1 %845 }
 0x4bd   : > { %849 = vst.msk [vmem:[#allocation3] sm:$0xff] %vm848_vm6, %v846_v15 }
 0x4c6   : > { %v1017_v16 = vpop.permute.xlu1 %1016 }
 0x4c7   : > { %1020 = vst.msk [vmem:[#allocation3] sm:$0xff] %vm1019_vm7, %v1017_v16 }
 0x4ce   : > { %v1022_v17 = vld [vmem:[#allocation3] sm:$0xff] }
 0x4cf   : > { %1351 = vmatmul.mubr.msk.f32.vlgmr.msra.gmra.mrb[8].mxu0 %vm1027_vm8, %v1022_v17 }
 0x59f   : > { %1106 = sbr.rel (%p1265_p4) target bundleno = 1456 (0x5b0), region = 56 }
 0x5a2   : > { %v1097_v19 = vpop.f32.mrb[8].mxu0 }
 0x5a3   : > { %v1101_v20 = vadd.f32 %v1097_v19, %v1021_v18  ;;  %v1352_v21 = vpop.f32.mrb[9].mxu0 }
 0x5a5   : > { %1102 = vst.msk [vmem:[#allocation2] sm:$0xff] %vm267_vm2, %v1101_v20 }
 0x5ac   : > { %v1107_v22 = vld [vmem:[#allocation2] sm:$0xff] }
 0x5ad   : > { %v1115_v24 = vadd.f32 %v1266_v23, %v1107_v22 }
 0x5af   : > { %1116 = vst.msk [vmem:[%s1943_s29] sm:$0xff] %vm267_vm2, %v1115_v24 }
 0x5b0 PF: > { %s1268_s8 = sshll.u32 %s1673_s19, 7  ;;  %s1131_s23 = sshll.u32 %s1943_s29, 4  ;;  %s1132_s23 = int_to_ptr.vmem [resolvable:$true] %s1131_s23 }
 0x5b1   : > { %s2023_s18 = scalar_lea.hbm %s2076_s4, %s1268_s8  ;;  %s1118_s24 = scalar_lea.sflag [#allocation6], %s1931_s30 }
 0x5b2   : > { %s1583_s26 = scalar_lea.vmem %s1132_s23, 128  ;;  %s1710_s5 = smov [#allocation10]  }
 0x5b3   : > { %p1584_p10 = scmp.ne.s32.totalorder %s1132_s23, %s1583_s26  ;;  %s1587_s25 = sshll.u32 %s1710_s5, 4  ;;  %s1588_s25 = int_to_ptr.vmem [resolvable:$false] %s1587_s25 }
 0x5b4   : > { %s1589_s27 = scalar_lea.vmem %s1588_s25, 256  ;;  %p1590_p3 = scmp.lt.s32.totalorder %s1132_s23, %s1588_s25 }
 0x5b5   : > { %p1585_p8 = pnand %p1584_p10, %p1876_p6  ;;  %p1591_p7 = scmp.lt.s32.totalorder %s1589_s27, %s1583_s26 }
 0x5b7   : > { %p1586_p13 = pneg %p1585_p8  ;;  %p1592_p12 = por %p1591_p7, %p1590_p3 }
 0x5b9   : > { %p1593_p11 = pnand %p1592_p12, %p1586_p13 }
 0x5bb   : > { %1596 = shalt.err (!%p1593_p11)
}
 0x5bc   : > { %s1597_s19 = scalar_lea.hbm %s2023_s18, 128  ;;  %s1601_s28 = scalar_lea.hbm %s2076_s4, 256 }
 0x5bd   : > { %p1598_p1 = scmp.ne.s32.totalorder %s2023_s18, %s1597_s19  ;;  %p1602_p2 = scmp.lt.u32.totalorder %s2023_s18, %s2076_s4 }
 0x5be   : > { %p1603_p0 = scmp.lt.u32.totalorder %s1601_s28, %s1597_s19  ;;  %p1605_p10 = scmp.lt.u32.totalorder %s1597_s19, %s2023_s18 }
 0x5bf   : > { %p1599_p9 = pnand %p1598_p1, %p1876_p6 }
 0x5c0   : > { %p1604_p4 = por %p1603_p0, %p1602_p2 }
 0x5c1   : > { %p1600_p5 = pneg %p1599_p9 }
 0x5c2   : > { %p1606_p8 = por %p1605_p10, %p1604_p4 }
 0x5c4   : > { %p1607_p13 = pnand %p1606_p8, %p1600_p5 }
 0x5c6   : > { %1610 = shalt.err (!%p1607_p13)
}
 0x5c7   : > { %1372 = dma.vmem_to_hbm [thread:$0]  (%p1876_p6), %s1132_s23, 128, %s2023_s18, %s1118_s24  }
 0x5c8 PF: > { %s2098_s6 = sld [smem:[#allocation14_spill]]  ;;  %p1394_p3 = scmp.ge.s32.totalorder %s1685_s22, 2 }
 0x5c9   : > { %s1143_s8 = sand.u32 1, %s1657_s15  }
 0x5ca   : > { %s1144_s12 = scalar_lea.sflag [#allocation6], %s1143_s8 }
 0x5ce   : > { %p2099_p7 = scmp.ne.s32.totalorder %s2098_s6, 0 }
 0x5d0   : > { %p1386_p12 = pnand %p1394_p3, %p2099_p7 }
 0x5d2   : > { %1652 = dma.done.wait (!%p1386_p12), %s1144_s12, 128  }
 0x5d3   : > { %1654 = vsyncadd (!%p1386_p12), %s1144_s12, 4294967168  ;;  %s21_s22 = sadd.s32 1, %s1685_s22   ;;  %s2100_s15 = smov %s1661_s16 }
 0x5d4   : > { %p18_p11 = scmp.ge.s32.totalorder %s21_s22, 6   ;;  %s2101_s16 = smov %s1665_s17 }
 0x5d5   : > { %s2102_s17 = smov %s1899_s1  ;;  %s2103_s18 = smov %s1677_s20 }
 0x5d6   : > { %s2104_s19 = smov %s1681_s21  ;;  %s2105_s20 = smov %s2108_s10 }
 0x5d7   : > { %s2106_s21 = smov %s2112_s11  ;;  %20 = sbr.rel (!%p18_p11) target bundleno = 10 (0xa), region = 99 }
 0x5de   :  { %1149 = vsyncpa [#allocation5], 1 }
 0x5df   :  { %1151 = vsyncpa [#allocation5 + $0x1], 1 }
 0x5e0   :  { %1152 = vsyncpa [#allocation8], 1 }
 0x5e1   :  { %1153 = vsyncpa [#allocation6], 1 }
 0x5e2   :  { %1155 = vsyncpa [#allocation6 + $0x1], 1 }

</bundles_post_ra>
